<compile_context>
chip_gen: v6e
topology: v6e:2x2x1
jax: 0.10.0
libtpu: 0.0.40
codegen_flags: <defaults>
</compile_context>

<pallas_src>
import jax
import jax.numpy as jnp
from jax.experimental import pallas as pl
from jax.experimental.pallas import tpu as pltpu

VOCAB = 32
FEATURE_LEN = 128

_ROW_GROUP = 128                 # rows per in-kernel chunk (= lane width)
_MAX_ROW_TILE = 4096             # rows per grid step (2 MiB f32 output block)
_MIN_GRID_STEPS = 4              # keep >= 4 steps when possible (v7x megacore)
_MIN_KERNEL_BYTES = 1 << 20      # below this, XLA's fused gather wins
_VMEM_LIMIT_BYTES = 32 * 1024 * 1024


def _cdiv(a: int, b: int) -> int:
    return -(-a // b)


def _vectorize_kernel(idx_ref, emb_ref, out_ref):
    """One row tile: out[r] = emb[idx[r]].

    idx_ref: VMEM (sub, 128) int32   lane-dense ids; tile row r = 128*s + l
             lives at [s, l].
    emb_ref: VMEM (vocab, d) bf16    full table (grid-invariant block).
    out_ref: VMEM (sub*128, d)       output tile.
    """
    vocab = emb_ref.shape[0]
    nsub, lanes = idx_ref.shape
    emb = emb_ref[...]                                               # (vocab, d)
    ids = idx_ref[...]                                               # (sub, 128)
    vocab_iota = jax.lax.broadcasted_iota(jnp.int32, (vocab, lanes), 0)
    for c in range(nsub):                      # static trip count -> unrolled
        row_ids = ids[c:c + 1, :]                                    # (1, 128)
        # Transposed one-hot: onehot_t[v, l] = (idx[l] == v); ids stay lane-dense.
        onehot_t = (vocab_iota == row_ids).astype(jnp.float32)       # (vocab, 128)
        onehot = jnp.transpose(onehot_t).astype(emb.dtype)           # (128, vocab)
        # bf16 x bf16 -> f32 accumulate: native MXU path; exact for one-hot.
        chunk = jnp.dot(onehot, emb, preferred_element_type=jnp.float32)
        out_ref[pl.ds(c * lanes, lanes), :] = chunk.astype(out_ref.dtype)


class EmbeddingVectorizer:
    """Concrete VectorizerBase: (batch, seq) ids -> (batch, seq, feature_len)."""

    def __init__(self, vocab: int = VOCAB, feature_len: int = FEATURE_LEN, seed: int = 0):
        self._feature_len = feature_len
        key = jax.random.PRNGKey(seed)
        # bf16 parameters: MXU-native on all TPU generations (see header note).
        self.embedding = jax.random.normal(
            key, (vocab, feature_len), jnp.float32).astype(jnp.bfloat16)

    def feature_len(self) -> int:
        return self._feature_len

    def __call__(self, indices: jax.Array, *, force_kernel: bool = False,
                 out_dtype=jnp.float32) -> jax.Array:
        # PyTorch uses Long indices; TPU prefers int32.
        indices = indices.astype(jnp.int32)
        batch, seq = indices.shape
        vocab, d = self.embedding.shape
        n_rows = batch * seq
        out_bytes = jnp.dtype(out_dtype).itemsize

        # Tiny problems: pallas_call launch + pipeline setup exceeds total HBM
        # traffic, so let XLA's fused gather handle them.
        if not force_kernel and n_rows * d * out_bytes < _MIN_KERNEL_BYTES:
            return jnp.take(self.embedding, indices, axis=0).astype(out_dtype)

        # Balanced tiling: tiles of up to _MAX_ROW_TILE rows, >= _MIN_GRID_STEPS
        # grid steps when the input is big enough, padding < 128*num_tiles rows.
        rows128 = _cdiv(n_rows, _ROW_GROUP)
        num_tiles = min(rows128,
                        max(_MIN_GRID_STEPS, _cdiv(n_rows, _MAX_ROW_TILE)))
        sub = _cdiv(rows128, num_tiles)
        tile = sub * _ROW_GROUP
        padded = tile * num_tiles

        idx_flat = indices.reshape(-1)
        if padded != n_rows:
            idx_flat = jnp.pad(idx_flat, (0, padded - n_rows))   # pad id 0 (valid row)
        idx_lanes = idx_flat.reshape(num_tiles, sub, _ROW_GROUP)

        out_flat = pl.pallas_call(
            _vectorize_kernel,
            out_shape=jax.ShapeDtypeStruct((padded, d), out_dtype),
            grid=(num_tiles,),
            in_specs=[
                # lane-dense ids: contiguous 4*tile-byte DMA per grid step
                pl.BlockSpec((None, sub, _ROW_GROUP), lambda i: (i, 0, 0)),
                # full table, grid-invariant block -> stays VMEM resident
                pl.BlockSpec((vocab, d), lambda i: (0, 0)),
            ],
            out_specs=pl.BlockSpec((tile, d), lambda i: (i, 0)),
            compiler_params=pltpu.CompilerParams(
                dimension_semantics=("parallel",),     # row tiles independent
                vmem_limit_bytes=_VMEM_LIMIT_BYTES,
            ),
            cost_estimate=pl.CostEstimate(
                flops=2 * padded * vocab * d,
                transcendentals=0,
                bytes_accessed=padded * d * out_bytes + padded * 4 + vocab * d * 2,
            ),
        )(idx_lanes, self.embedding)

        return out_flat[:n_rows].reshape(batch, seq, d)


if __name__ == "__main__":
    key = jax.random.PRNGKey(0)
    vectorizer = EmbeddingVectorizer()

    def ref_lookup(idx):
        return jnp.take(vectorizer.embedding, idx, axis=0).astype(jnp.float32)

    # Small shape from the module spec (batch=2, seq=8): forced kernel path.
    idx_small = jax.random.randint(key, (2, 8), 0, VOCAB, dtype=jnp.int32)
    out_small = jax.block_until_ready(vectorizer(idx_small, force_kernel=True))
    assert out_small.shape == (2, 8, vectorizer.feature_len())
    assert out_small.dtype == jnp.float32
    assert jnp.allclose(out_small, ref_lookup(idx_small))

    # Ragged shape: exercises row padding + a multi-step grid.
    idx_ragged = jax.random.randint(jax.random.fold_in(key, 1), (5, 37), 0,
                                    VOCAB, dtype=jnp.int32)
    out_ragged = jax.block_until_ready(vectorizer(idx_ragged, force_kernel=True))
    assert jnp.allclose(out_ragged, ref_lookup(idx_ragged))

    # Larger shape: auto kernel path, multi-chunk tiles (2048 rows / grid step).
    idx_big = jax.random.randint(jax.random.fold_in(key, 2), (8, 1024), 0,
                                 VOCAB, dtype=jnp.int32)
    out_big = jax.block_until_ready(vectorizer(idx_big))
    assert jnp.allclose(out_big, ref_lookup(idx_big))

    print("KERNEL_OK")
</pallas_src>

<mosaic_0001>
module attributes {stable_mosaic.version = 11 : i64} {
  func.func @_vectorize_kernel(%arg0: i32, %arg1: memref<1x1x128xi32, #tpu.memory_space<vmem>>, %arg2: memref<32x128xbf16, #tpu.memory_space<vmem>>, %arg3: memref<128x128xf32, #tpu.memory_space<vmem>>) attributes {dimension_semantics = [#tpu.dimension_semantics<parallel>], iteration_bounds = array<i64: 1>, scalar_prefetch = 0 : i64, scratch_operands = 0 : i64, tpu.core_type = #tpu.core_type<tc>, window_params = [{transform_indices = @transform_0, window_bounds = array<i64: 1, 1, 128>}, {pipeline_mode = #tpu.pipeline_mode<synchronous>, transform_indices = @transform_1, window_bounds = array<i64: 32, 128>}, {transform_indices = @transform_2, window_bounds = array<i64: 128, 128>}]} {
    %c0 = arith.constant 0 : index
    %c0_0 = arith.constant 0 : index
    %0 = vector.load %arg2[%c0, %c0_0] : memref<32x128xbf16, #tpu.memory_space<vmem>>, vector<32x128xbf16>
    %c0_1 = arith.constant 0 : index
    %c0_2 = arith.constant 0 : index
    %c0_3 = arith.constant 0 : index
    %1 = vector.load %arg1[%c0_1, %c0_2, %c0_3] : memref<1x1x128xi32, #tpu.memory_space<vmem>>, vector<1x1x128xi32>
    %2 = vector.shape_cast %1 : vector<1x1x128xi32> to vector<1x128xi32>
    %3 = tpu.iota {dimensions = array<i32: 0>} : vector<32x128xi32>
    %4 = vector.broadcast %2 : vector<1x128xi32> to vector<32x128xi32>
    %5 = arith.cmpi eq, %3, %4 : vector<32x128xi32>
    %6 = arith.extui %5 : vector<32x128xi1> to vector<32x128xi32>
    %7 = arith.sitofp %6 : vector<32x128xi32> to vector<32x128xf32>
    %8 = tpu.transpose %7, [1, 0] : vector<32x128xf32> -> vector<128x32xf32>
    %9 = arith.truncf %8 : vector<128x32xf32> to vector<128x32xbf16>
    %cst = arith.constant dense<0.000000e+00> : vector<128x128xf32>
    %10 = tpu.matmul %9, %0, %cst {dimension_numbers = #tpu.dot_dimension_numbers<[1], [0], [0], [1], [0, 0, 1, 1], [], []>} : vector<128x32xbf16>, vector<32x128xbf16>, vector<128x128xf32> -> vector<128x128xf32>
    %c0_4 = arith.constant 0 : index
    %c0_5 = arith.constant 0 : index
    %11 = vector.load %arg3[%c0_4, %c0_5] : memref<128x128xf32, #tpu.memory_space<vmem>>, vector<128x128xf32>
    tpu.vector_store %arg3[%c0_4, %c0_5], %10 {strides = array<i32>} : memref<128x128xf32, #tpu.memory_space<vmem>>, vector<128x128xf32>,
    return
  }
  func.func @transform_0(%arg0: i32) -> (i32, i32, i32) {
    %c0_i32 = arith.constant 0 : i32
    %c0_i32_0 = arith.constant 0 : i32
    %c0_i32_1 = arith.constant 0 : i32
    return %arg0, %c0_i32, %c0_i32_0 : i32, i32, i32
  }
  func.func @transform_1(%arg0: i32) -> (i32, i32) {
    %c0_i32 = arith.constant 0 : i32
    %c0_i32_0 = arith.constant 0 : i32
    %c0_i32_1 = arith.constant 0 : i32
    return %c0_i32, %c0_i32_0 : i32, i32
  }
  func.func @transform_2(%arg0: i32) -> (i32, i32) {
    %c0_i32 = arith.constant 0 : i32
    %c0_i32_0 = arith.constant 0 : i32
    return %arg0, %c0_i32 : i32, i32
  }
}

</mosaic_0001>

<bundles_post_ra>
// kernel: tpu_custom_call.1
= control target key start
LH: loop header
LB: loop body
LE: loop exit
PB: predicated region body
PF: predicated region fallthrough
CT: control target
= control target key end

     0   :  { %7 = vsyncpa [#allocation3], 0  ;;  %s438_s0 = inlined_call_operand.hbm [shape: s32[1,1,128], index: 0, kind: input, shape index: {}]   ;;  %s439_s1 = inlined_call_operand.hbm [shape: bf16[32,128], index: 1, kind: input, shape index: {}]   ;;  %s440_s2 = inlined_call_operand.hbm [shape: f32[128,128], index: 2, kind: output, shape index: {}]  }
   0x1   :  { %8 = vsyncpa [#allocation6], 0 }
   0x2   :  { %9 = vsyncpa [#allocation4], 0  ;;  %s398_s9 = smov [#allocation2]   ;;  %s399_s11 = smov [#allocation5]  }
   0x3   :  { %s16_s10 = sshll.u32 %s398_s9, 4  ;;  %s25_s12 = sshll.u32 %s399_s11, 4  ;;  %s17_s10 = int_to_ptr.vmem [resolvable:$true] %s16_s10  ;;  %s26_s12 = int_to_ptr.vmem [resolvable:$true] %s25_s12 }
   0x4   :  { %s340_s13 = scalar_lea.vmem %s17_s10, 16  ;;  %s344_s14 = scalar_lea.vmem %s17_s10, 32 }
   0x5   :  { %p341_p0 = scmp.ne.s32.totalorder %s17_s10, %s340_s13  ;;  %p345_p1 = scmp.lt.s32.totalorder %s17_s10, %s17_s10 }
   0x6   :  { %p346_p2 = scmp.lt.s32.totalorder %s344_s14, %s340_s13 }
   0x8   :  { %p347_p3 = por %p346_p2, %p345_p1 }
   0xa   :  { %p348_p4 = pnand %p347_p3, %p341_p0 }
   0xc   :  { %351 = shalt.err (!%p348_p4)
}
   0xd   :  { %19 = dma.hbm_to_vmem [thread:$0]  %s438_s0, 16, %s17_s10, [#allocation3]  }
   0xe   :  { %s360_s17 = scalar_lea.vmem %s26_s12, 256  ;;  %p365_p6 = scmp.lt.s32.totalorder %s26_s12, %s26_s12 }
   0xf   :  { %p361_p5 = scmp.ne.s32.totalorder %s26_s12, %s360_s17  ;;  %p366_p7 = scmp.lt.s32.totalorder %s360_s17, %s360_s17 }
  0x11   :  { %p367_p8 = por %p366_p7, %p365_p6 }
  0x13   :  { %p368_p9 = pnand %p367_p8, %p361_p5 }
  0x15   :  { %371 = shalt.err (!%p368_p9)
}
  0x16   :  { %s400_s18 = smov 64   ;;  %s401_s19 = smov 4  }
  0x17   :  { %31 = dma.hbm_to_vmem [thread:$0]  %s439_s1, 256, %s26_s12, [#allocation6], %s400_s18, %s400_s18, %s401_s19  }
  0x18   :  { %392 = dma.done.wait [#allocation3], 16  }
  0x19   :  { %393 = vsyncadd [#allocation3], 4294967280 }
  0x1a   :  { %394 = dma.done.wait [#allocation6], 256  }
  0x1b   :  { %395 = vsyncadd [#allocation6], 4294967040  ;;  %v44_v0 = vlaneseq  ;;  %v273_v3 = vld [vmem:[#allocation2] ss:$0 sm:$0xff]  ;;  %v402_v5 = vmov 0.0   ;;  %v330_v8 = vld [vmem:[#allocation5 + $0x8] sm:$0xff]  }
  0x1c   :  { %298 = vmatprep.subr.bf16.mxu0 %v330_v8  ;;  %318 = vmatprep.subr.bf16.mxu1 %v330_v8  ;;  %v331_v10 = vld [vmem:[#allocation5] sm:$0xff]   ;;  %vm117_vm4 = vcmask 261120   ;;  %s403_s0 = smov [#allocation7]  }
  0x1d   :  { %v45_v1 = vshrl.u32 %v44_v0, 7  ;;  %299 = vmatpush3.bf16.msra.mxu0 %v330_v8  ;;  %320 = vmatpush3.bf16.msra.mxu1 %v330_v8  ;;  %s260_s1 = sshll.u32 %s403_s0, 4  ;;  %s261_s1 = int_to_ptr.vmem [resolvable:$true] %s260_s1 }
  0x1e   :  { %300 = vmatprep.subr.bf16.mxu0 %v331_v10  ;;  %319 = vmatprep.subr.bf16.mxu1 %v331_v10  ;;  %s372_s22 = scalar_lea.vmem %s261_s1, 2048  ;;  %p377_p11 = scmp.lt.s32.totalorder %s261_s1, %s261_s1 }
  0x1f   :  { %v46_v2 = vadd.s32 8, %v45_v1  ;;  %vm53_vm0 = vcmp.eq.s32.totalorder %v45_v1, %v273_v3  ;;  %v47_v4 = vadd.s32 16, %v45_v1  ;;  %v48_v9 = vadd.s32 24, %v45_v1  ;;  %p373_p10 = scmp.ne.s32.totalorder %s261_s1, %s372_s22  ;;  %p378_p12 = scmp.lt.s32.totalorder %s372_s22, %s372_s22 }
  0x20   :  { %v274_v6 = vsel %vm53_vm0, 1.0, %v402_v5 }
  0x21   :  { %vm54_vm1 = vcmp.eq.s32.totalorder %v46_v2, %v273_v3  ;;  %65 = vxpose.xlu0.b32.start [1/4] (short) %v274_v6, 128  ;;  %vm55_vm2 = vcmp.eq.s32.totalorder %v47_v4, %v273_v3  ;;  %vm56_vm3 = vcmp.eq.s32.totalorder %v48_v9, %v273_v3  ;;  %301 = vmatpush3.bf16.msra.mxu0 %v331_v10  ;;  %p379_p13 = por %p378_p12, %p377_p11 }
  0x22   :  { %v275_v7 = vsel %vm54_vm1, 1.0, %v402_v5  ;;  %v276_v11 = vsel %vm55_vm2, 1.0, %v402_v5  ;;  %v277_v12 = vsel %vm56_vm3, 1.0, %v402_v5  ;;  %321 = vmatpush3.bf16.msra.mxu1 %v331_v10 }
  0x23   :  { %p380_p0 = pnand %p379_p13, %p373_p10 }
  0x25   :  { %66 = vxpose.xlu0.b32.cont [2/4] (short) %v275_v7, 128 }
  0x29   :  { %67 = vxpose.xlu0.b32.cont [3/4] (short) %v276_v11, 128 }
  0x2d   :  { %68 = vxpose.xlu0.b32.end [4/4] (short) %v277_v12, 128 }
  0x9d   :  { %v81_v13 = vpop.trf.xlu0 }
  0xa1   :  { %v82_v14 = vpop.trf.xlu0 }
  0xa2   :  { %v97_v15 = vpack.c.bf16 %v82_v14, %v81_v13 }
  0xa4   :  { %302 = vmatprep.mubr.msk.bf16.mxu0 %vm117_vm4, %v97_v15 }
  0xa5   :  { %v83_v16 = vpop.trf.xlu0 }
  0xa9   :  { %v84_v17 = vpop.trf.xlu0 }
  0xaa   :  { %v98_v18 = vpack.c.bf16 %v84_v17, %v83_v16 }
  0xac   :  { %303 = vmatmul.mubr.msk.bf16.vlgmr.msra.gmra.mxu0 %vm117_vm4, %v98_v18 }
  0xad   :  { %v85_v19 = vpop.trf.xlu0 }
  0xb1   :  { %v86_v20 = vpop.trf.xlu0 }
  0xb2   :  { %v99_v21 = vpack.c.bf16 %v86_v20, %v85_v19 }
  0xb4   :  { %306 = vmatprep.mubr.msk.bf16.mxu0 %vm117_vm4, %v99_v21 }
  0xb5   :  { %v87_v22 = vpop.trf.xlu0 }
  0xb9   :  { %v88_v23 = vpop.trf.xlu0 }
  0xba   :  { %v100_v24 = vpack.c.bf16 %v88_v23, %v87_v22 }
  0xbc   :  { %307 = vmatmul.mubr.msk.bf16.gmra.mxu0 %vm117_vm4, %v100_v24 }
  0xbd   :  { %v89_v25 = vpop.trf.xlu0 }
  0xc1   :  { %v90_v26 = vpop.trf.xlu0 }
  0xc2   :  { %v101_v27 = vpack.c.bf16 %v90_v26, %v89_v25 }
  0xc4   :  { %310 = vmatprep.mubr.msk.bf16.mxu1 %vm117_vm4, %v101_v27 }
  0xc5   :  { %v91_v28 = vpop.trf.xlu0 }
  0xc9   :  { %v92_v29 = vpop.trf.xlu0 }
  0xca   :  { %v102_v30 = vpack.c.bf16 %v92_v29, %v91_v28 }
  0xcc   :  { %311 = vmatmul.mubr.msk.bf16.vlgmr.msra.gmra.mxu1 %vm117_vm4, %v102_v30 }
  0xcd   :  { %v93_v31 = vpop.trf.xlu0 }
  0xd1   :  { %v94_v32 = vpop.trf.xlu0 }
  0xd2   :  { %v103_v33 = vpack.c.bf16 %v94_v32, %v93_v31 }
  0xd4   :  { %314 = vmatprep.mubr.msk.bf16.mxu1 %vm117_vm4, %v103_v33 }
  0xd5   :  { %v95_v34 = vpop.trf.xlu0 }
  0xd9   :  { %v96_v35 = vpop.trf.xlu0 }
  0xda   :  { %v104_v36 = vpack.c.bf16 %v96_v35, %v95_v34 }
  0xdc   :  { %315 = vmatmul.mubr.msk.bf16.gmra.mxu1 %vm117_vm4, %v104_v36 }
 0x16c   :  { %v304_v37 = vpop.f32.mrf.mxu0 }
 0x16d   :  { %241 = vst [vmem:[#allocation7 + $0x10] sm:$0xff] %v304_v37 }
 0x16e   :  { %v176_v38 = vpop.f32.mrf.mxu0 }
 0x16f   :  { %239 = vst [vmem:[#allocation7] sm:$0xff] %v176_v38 }
 0x170   :  { %v305_v39 = vpop.f32.mrf.mxu0 }
 0x171   :  { %242 = vst [vmem:[#allocation7 + $0x18] sm:$0xff] %v305_v39 }
 0x172   :  { %v179_v40 = vpop.f32.mrf.mxu0 }
 0x173   :  { %240 = vst [vmem:[#allocation7 + $0x8] sm:$0xff] %v179_v40 }
 0x17c   :  { %v308_v41 = vpop.f32.mrf.mxu0 }
 0x17d   :  { %245 = vst [vmem:[#allocation7 + $0x30] sm:$0xff] %v308_v41 }
 0x17e   :  { %v192_v42 = vpop.f32.mrf.mxu0 }
 0x17f   :  { %243 = vst [vmem:[#allocation7 + $0x20] sm:$0xff] %v192_v42 }
 0x180   :  { %v309_v43 = vpop.f32.mrf.mxu0 }
 0x181   :  { %246 = vst [vmem:[#allocation7 + $0x38] sm:$0xff] %v309_v43 }
 0x182   :  { %v195_v44 = vpop.f32.mrf.mxu0 }
 0x183   :  { %244 = vst [vmem:[#allocation7 + $0x28] sm:$0xff] %v195_v44 }
 0x18c   :  { %v312_v45 = vpop.f32.mrf.mxu1 }
 0x18d   :  { %249 = vst [vmem:[#allocation7 + $0x50] sm:$0xff] %v312_v45 }
 0x18e   :  { %v208_v46 = vpop.f32.mrf.mxu1 }
 0x18f   :  { %247 = vst [vmem:[#allocation7 + $0x40] sm:$0xff] %v208_v46 }
 0x190   :  { %v313_v47 = vpop.f32.mrf.mxu1 }
 0x191   :  { %250 = vst [vmem:[#allocation7 + $0x58] sm:$0xff] %v313_v47 }
 0x192   :  { %v211_v48 = vpop.f32.mrf.mxu1 }
 0x193   :  { %248 = vst [vmem:[#allocation7 + $0x48] sm:$0xff] %v211_v48 }
 0x19c   :  { %v316_v49 = vpop.f32.mrf.mxu1 }
 0x19d   :  { %253 = vst [vmem:[#allocation7 + $0x70] sm:$0xff] %v316_v49 }
 0x19e   :  { %v224_v50 = vpop.f32.mrf.mxu1 }
 0x19f   :  { %251 = vst [vmem:[#allocation7 + $0x60] sm:$0xff] %v224_v50 }
 0x1a0   :  { %v317_v51 = vpop.f32.mrf.mxu1 }
 0x1a1   :  { %254 = vst [vmem:[#allocation7 + $0x78] sm:$0xff] %v317_v51 }
 0x1a2   :  { %v227_v52 = vpop.f32.mrf.mxu1 }
 0x1a3   :  { %252 = vst [vmem:[#allocation7 + $0x68] sm:$0xff] %v227_v52 }
 0x1a4   :  { %383 = shalt.err (!%p380_p0)
}
 0x1a5   :  { %s404_s23 = smov 128   ;;  %s405_s24 = smov 8  }
 0x1a6   :  { %266 = dma.vmem_to_hbm [thread:$0]  %s261_s1, 2048, %s440_s2, [#allocation4], %s404_s23, %s404_s23, %s405_s24  }
 0x1a7   :  { %396 = dma.done.wait [#allocation4], 2048  }
 0x1a8   :  { %397 = vsyncadd [#allocation4], 4294965248 }
 0x1a9   :  { %270 = vsyncpa [#allocation3], 1 }
 0x1aa   :  { %271 = vsyncpa [#allocation6], 1 }
 0x1ab   :  { %272 = vsyncpa [#allocation4], 1 }

</bundles_post_ra>
